<compile_context>
chip_gen: v7x
topology: tpu7x:2x2x1
jax: 0.10.0
libtpu: 0.0.40
codegen_flags: <defaults>
</compile_context>

<pallas_src>
import functools

import jax
import jax.numpy as jnp
from jax import lax
from jax.experimental import pallas as pl
from jax.experimental.pallas import tpu as pltpu


def _focal_loss_kernel(logits_ref, tgt_ref, out_ref, *, gamma):
    x = logits_ref[...].astype(jnp.float32)           # (tn, C)
    t = tgt_ref[...]                                   # (tn, 1) int32

    # Numerically stable log-sum-exp over the class (lane) axis.
    m = jnp.max(x, axis=-1, keepdims=True)             # (tn, 1)
    lse = m + jnp.log(jnp.sum(jnp.exp(x - m), axis=-1, keepdims=True))

    # Gather logits[row, target[row]] via a one-hot mask (no gather op needed).
    cls_idx = jax.lax.broadcasted_iota(jnp.int32, x.shape, 1)
    x_t = jnp.sum(jnp.where(cls_idx == t, x, 0.0), axis=-1, keepdims=True)

    ce = lse - x_t                                      # (tn, 1) per-sample CE
    pt = jnp.exp(-ce)
    one_minus_pt = 1.0 - pt

    # gamma=2 (and any integer gamma) -> integer_pow: pure VPU multiplies,
    # no exp/log round-trip, no NaN when rounding makes ce slightly negative.
    if float(gamma).is_integer():
        w = lax.integer_pow(one_minus_pt, int(gamma))
    else:
        w = jnp.maximum(one_minus_pt, 0.0) ** gamma     # clamp to avoid log(neg)

    # TODO(synk): alpha-weighting (alpha_t gather) not implemented since alpha=None by default.
    out_ref[...] = (w * ce).astype(out_ref.dtype)       # per-row focal loss


def _pick_tile_n(n, c, *, vmem_budget=24 << 20, max_tile=1024):
    """Largest row tile (multiple of 8) that fits the VMEM budget; prefer an
    exact divisor of n so no padding copy of the logits is needed."""
    # double-buffered logits + targets + per-row output (f32 worst case)
    bytes_per_row = 2 * (c * 4 + 4) + 2 * 4
    cap = max(8, min(max_tile, vmem_budget // bytes_per_row))
    cap = (cap // 8) * 8
    t = cap
    while t >= 8:
        if n % t == 0:
            return t
        t -= 8
    # no divisor that is a multiple of 8 -> pad the batch up to the tile
    return min(cap, ((n + 7) // 8) * 8)


def focal_loss(logits, targets, *, gamma=2.0, reduction="mean", tile_n=None):
    """FocalLoss1.forward (alpha=None). reduction in {'mean','sum','none'}."""
    n, c = logits.shape
    if tile_n is None:
        tile_n = _pick_tile_n(n, c)
    assert tile_n % 8 == 0

    n_pad = pl.cdiv(n, tile_n) * tile_n
    pad = n_pad - n
    if pad:
        # Padded rows are sliced away before the reduction, so their values
        # never contribute to the loss.
        logits = jnp.pad(logits, ((0, pad), (0, 0)))
        targets = jnp.pad(targets, (0, pad))
    targets2d = targets.astype(jnp.int32).reshape(n_pad, 1)
    num_tiles = n_pad // tile_n

    kernel = functools.partial(_focal_loss_kernel, gamma=float(gamma))

    per_row = pl.pallas_call(
        kernel,
        out_shape=jax.ShapeDtypeStruct((n_pad, 1), jnp.float32),
        grid_spec=pltpu.PrefetchScalarGridSpec(
            num_scalar_prefetch=0,
            grid=(num_tiles,),
            in_specs=[
                pl.BlockSpec((tile_n, c), lambda i: (i, 0)),
                pl.BlockSpec((tile_n, 1), lambda i: (i, 0)),
            ],
            out_specs=pl.BlockSpec((tile_n, 1), lambda i: (i, 0)),
        ),
        compiler_params=pltpu.CompilerParams(
            dimension_semantics=("parallel",),      # no cross-step accumulator
            vmem_limit_bytes=32 * 1024 * 1024,      # portable across v5e/v6e/v7x
        ),
    )(logits, targets2d)

    per_row = per_row[:n, 0]
    if reduction == "mean":
        return jnp.mean(per_row)
    elif reduction == "sum":
        return jnp.sum(per_row)
    return per_row


def _focal_loss_ref(logits, targets, gamma=2.0):
    logits = logits.astype(jnp.float32)
    lse = jax.scipy.special.logsumexp(logits, axis=-1)
    x_t = jnp.take_along_axis(logits, targets[:, None], axis=-1)[:, 0]
    ce = lse - x_t
    pt = jnp.exp(-ce)
    return jnp.mean(((1.0 - pt) ** gamma) * ce)


if __name__ == "__main__":
    key = jax.random.PRNGKey(0)
    k1, k2 = jax.random.split(key)

    N, C = 64, 16
    logits = jax.random.normal(k1, (N, C), dtype=jnp.float32)
    targets = jax.random.randint(k2, (N,), 0, C, dtype=jnp.int32)

    loss = jax.block_until_ready(focal_loss(logits, targets, gamma=2.0))
    ref = jax.block_until_ready(_focal_loss_ref(logits, targets, gamma=2.0))
    assert jnp.allclose(loss, ref, rtol=1e-5, atol=1e-5), (loss, ref)

    # Also exercise a non-divisible batch (padding path) and 'sum' reduction.
    N2 = 50
    logits2 = jax.random.normal(k1, (N2, C), dtype=jnp.float32)
    targets2 = jax.random.randint(k2, (N2,), 0, C, dtype=jnp.int32)
    loss2 = jax.block_until_ready(focal_loss(logits2, targets2, gamma=2.0))
    ref2 = jax.block_until_ready(_focal_loss_ref(logits2, targets2, gamma=2.0))
    assert jnp.allclose(loss2, ref2, rtol=1e-5, atol=1e-5), (loss2, ref2)

    print("KERNEL_OK")
</pallas_src>

<mosaic_0001>
module attributes {stable_mosaic.version = 11 : i64} {
  func.func @_focal_loss_kernel(%arg0: i32, %arg1: memref<64x16xf32, #tpu.memory_space<vmem>>, %arg2: memref<64x1xi32, #tpu.memory_space<vmem>>, %arg3: memref<64x1xf32, #tpu.memory_space<vmem>>) attributes {dimension_semantics = [#tpu.dimension_semantics<parallel>], iteration_bounds = array<i64: 1>, scalar_prefetch = 0 : i64, scratch_operands = 0 : i64, tpu.core_type = #tpu.core_type<tc>, window_params = [{transform_indices = @transform_0, window_bounds = array<i64: 64, 16>}, {transform_indices = @transform_1, window_bounds = array<i64: 64, 1>}, {transform_indices = @transform_2, window_bounds = array<i64: 64, 1>}]} {
    %c0 = arith.constant 0 : index
    %c0_0 = arith.constant 0 : index
    %0 = vector.load %arg1[%c0, %c0_0] : memref<64x16xf32, #tpu.memory_space<vmem>>, vector<64x16xf32>
    %c0_1 = arith.constant 0 : index
    %c0_2 = arith.constant 0 : index
    %1 = vector.load %arg2[%c0_1, %c0_2] : memref<64x1xi32, #tpu.memory_space<vmem>>, vector<64x1xi32>
    %cst = arith.constant dense<0xFF800000> : vector<64xf32>
    %2 = vector.multi_reduction <maximumf>, %0, %cst [1] : vector<64x16xf32> to vector<64xf32>
    %3 = vector.shape_cast %2 : vector<64xf32> to vector<64x1xf32>
    %4 = vector.broadcast %3 : vector<64x1xf32> to vector<64x16xf32>
    %5 = arith.subf %0, %4 : vector<64x16xf32>
    %6 = math.exp %5 : vector<64x16xf32>
    %cst_3 = arith.constant dense<0.000000e+00> : vector<64xf32>
    %7 = vector.multi_reduction <add>, %6, %cst_3 [1] : vector<64x16xf32> to vector<64xf32>
    %8 = vector.shape_cast %7 : vector<64xf32> to vector<64x1xf32>
    %9 = math.log %8 : vector<64x1xf32>
    %10 = arith.addf %3, %9 : vector<64x1xf32>
    %11 = tpu.iota {dimensions = array<i32: 1>} : vector<64x16xi32>
    %12 = vector.broadcast %1 : vector<64x1xi32> to vector<64x16xi32>
    %13 = arith.cmpi eq, %11, %12 : vector<64x16xi32>
    %cst_4 = arith.constant 0.000000e+00 : f32
    %14 = vector.broadcast %cst_4 : f32 to vector<64x16xf32>
    %15 = arith.select %13, %0, %14 : vector<64x16xi1>, vector<64x16xf32>
    %cst_5 = arith.constant dense<0.000000e+00> : vector<64xf32>
    %16 = vector.multi_reduction <add>, %15, %cst_5 [1] : vector<64x16xf32> to vector<64xf32>
    %17 = vector.shape_cast %16 : vector<64xf32> to vector<64x1xf32>
    %18 = arith.subf %10, %17 : vector<64x1xf32>
    %cst_6 = arith.constant 0.000000e+00 : f32
    %19 = vector.broadcast %cst_6 : f32 to vector<64x1xf32>
    %20 = arith.subf %19, %18 : vector<64x1xf32>
    %21 = math.exp %20 : vector<64x1xf32>
    %cst_7 = arith.constant 1.000000e+00 : f32
    %22 = vector.broadcast %cst_7 : f32 to vector<64x1xf32>
    %23 = arith.subf %22, %21 : vector<64x1xf32>
    %24 = arith.mulf %23, %23 : vector<64x1xf32>
    %25 = arith.mulf %24, %18 : vector<64x1xf32>
    %c0_8 = arith.constant 0 : index
    %c0_9 = arith.constant 0 : index
    %26 = vector.load %arg3[%c0_8, %c0_9] : memref<64x1xf32, #tpu.memory_space<vmem>>, vector<64x1xf32>
    tpu.vector_store %arg3[%c0_8, %c0_9], %25 {strides = array<i32>} : memref<64x1xf32, #tpu.memory_space<vmem>>, vector<64x1xf32>,
    return
  }
  func.func @transform_0(%arg0: i32) -> (i32, i32) {
    %c0_i32 = arith.constant 0 : i32
    %c0_i32_0 = arith.constant 0 : i32
    return %arg0, %c0_i32 : i32, i32
  }
  func.func @transform_1(%arg0: i32) -> (i32, i32) {
    %c0_i32 = arith.constant 0 : i32
    %c0_i32_0 = arith.constant 0 : i32
    return %arg0, %c0_i32 : i32, i32
  }
  func.func @transform_2(%arg0: i32) -> (i32, i32) {
    %c0_i32 = arith.constant 0 : i32
    %c0_i32_0 = arith.constant 0 : i32
    return %arg0, %c0_i32 : i32, i32
  }
}

</mosaic_0001>

<bundles_post_ra>
// kernel: tpu_custom_call.1
= control target key start
LH: loop header
LB: loop body
LE: loop exit
PB: predicated region body
PF: predicated region fallthrough
CT: control target
= control target key end

     0   :  { %vm27_vm0 = vcmask 130048   ;;  %v310_v3 = vmov 0   ;;  %v124_v53 = vlaneseq  ;;  %vm246_vm9 = vcmask 7168   ;;  %s506_s0 = inlined_call_operand.vmem [shape: f32[64,16], index: 0, kind: input, shape index: {}]   ;;  %s507_s1 = inlined_call_operand.vmem [shape: s32[64,1], index: 1, kind: input, shape index: {}]   ;;  %s508_s2 = inlined_call_operand.vmem [shape: f32[64,1], index: 2, kind: output, shape index: {}]  }
   0x1   :  { %v329_v0 = vld [vmem:[%s506_s0 + $0x10] sm:$0xff]  ;;  %v334_v1 = vld [vmem:[%s506_s0] sm:$0xff]  ;;  %v339_v2 = vld [vmem:[%s506_s0 + $0x18] sm:$0xff]  ;;  %261 = vset.pattern.permute.xlu1 %v310_v3  ;;  %260 = vset.pattern.permute.xlu0 %v310_v3 }
   0x2   :  { %v34_v4 = vsel %vm27_vm0, %v329_v0, -inf  ;;  %v28_v5 = vsel %vm27_vm0, %v334_v1, -inf  ;;  %v348_v6 = vld [vmem:[%s506_s0 + $0x8] sm:$0xff]  ;;  %v37_v7 = vsel %vm27_vm0, %v339_v2, -inf  ;;  %v362_v10 = vld [vmem:[%s506_s0 + $0x20] sm:$0xff]  ;;  %v371_v13 = vld [vmem:[%s506_s0 + $0x38] sm:$0xff] }
   0x3   :  { %35 = vmax.xlane.f32.xlu1 %v34_v4  ;;  %29 = vmax.xlane.f32.xlu0 %v28_v5  ;;  %v31_v8 = vsel %vm27_vm0, %v348_v6, -inf  ;;  %v357_v9 = vld [vmem:[%s506_s0 + $0x28] sm:$0xff]  ;;  %v40_v12 = vsel %vm27_vm0, %v362_v10, -inf  ;;  %v376_v14 = vld [vmem:[%s506_s0 + $0x30] sm:$0xff]  ;;  %v49_v15 = vsel %vm27_vm0, %v371_v13, -inf  ;;  %v19_v19 = vld [vmem:[%s507_s1] sm:$0xff] }
   0x4   :  { %v43_v11 = vsel %vm27_vm0, %v357_v9, -inf  ;;  %v46_v16 = vsel %vm27_vm0, %v376_v14, -inf  ;;  %v20_v17 = vld [vmem:[%s507_s1 + $0x8] sm:$0xff]  ;;  %v21_v18 = vld [vmem:[%s507_s1 + $0x10] sm:$0xff]  ;;  %v22_v20 = vld [vmem:[%s507_s1 + $0x18] sm:$0xff]  ;;  %v125_v60 = vand.u32 127, %v124_v53 }
   0x5   :  { %v23_v21 = vld [vmem:[%s507_s1 + $0x20] sm:$0xff]  ;;  %v24_v22 = vld [vmem:[%s507_s1 + $0x28] sm:$0xff]  ;;  %v25_v23 = vld [vmem:[%s507_s1 + $0x30] sm:$0xff] }
   0x6   :  { %v26_v24 = vld [vmem:[%s507_s1 + $0x38] sm:$0xff] }
   0x7   :  { %38 = vmax.xlane.f32.xlu1 %v37_v7  ;;  %32 = vmax.xlane.f32.xlu0 %v31_v8 }
   0xb   :  { %44 = vmax.xlane.f32.xlu1 %v43_v11  ;;  %41 = vmax.xlane.f32.xlu0 %v40_v12 }
   0xf   :  { %50 = vmax.xlane.f32.xlu1 %v49_v15  ;;  %47 = vmax.xlane.f32.xlu0 %v46_v16 }
  0x20   :  { %130 = vperm.xlu1 %261, %v20_v17  }
  0x24   :  { %133 = vperm.xlu1 %261, %v21_v18  }
  0x25   :  { %127 = vperm.xlu0 %260, %v19_v19  }
  0x28   :  { %136 = vperm.xlu1 %261, %v22_v20  }
  0x2c   :  { %139 = vperm.xlu1 %261, %v23_v21  }
  0x30   :  { %142 = vperm.xlu1 %261, %v24_v22  }
  0x34   :  { %145 = vperm.xlu1 %261, %v25_v23  }
  0x38   :  { %148 = vperm.xlu1 %261, %v26_v24  }
  0x90   :  { %v406_v25 = vpop.xlane.xlu1 %35  ;;  %v408_v26 = vpop.xlane.xlu0 %29 }
  0x91   :  { %v52_v27 = vsub.f32 %v334_v1, %v408_v26  ;;  %v54_v29 = vsub.f32 %v329_v0, %v406_v25 }
  0x93   :  { %v60_v28 = vmul.f32 1.442695, %v52_v27  ;;  %v64_v36 = vmul.f32 1.442695, %v54_v29 }
  0x94   :  { %v414_v30 = vpop.xlane.xlu1 %38  ;;  %v416_v31 = vpop.xlane.xlu0 %32 }
  0x95   :  { %v55_v32 = vsub.f32 %v339_v2, %v414_v30  ;;  %v53_v33 = vsub.f32 %v348_v6, %v416_v31  ;;  %262 = vpow2.f32 %v60_v28 }
  0x97   :  { %v66_v34 = vmul.f32 1.442695, %v55_v32  ;;  %v62_v35 = vmul.f32 1.442695, %v53_v33 }
  0x98   :  { %v422_v37 = vpop.xlane.xlu1 %44  ;;  %v424_v38 = vpop.xlane.xlu0 %41 }
  0x99   :  { %264 = vpow2.f32 %v66_v34  ;;  %v57_v39 = vsub.f32 %v357_v9, %v422_v37  ;;  %v56_v40 = vsub.f32 %v362_v10, %v424_v38 }
  0x9a   :  { %266 = vpow2.f32 %v62_v35 }
  0x9b   :  { %v70_v41 = vmul.f32 1.442695, %v57_v39  ;;  %v68_v42 = vmul.f32 1.442695, %v56_v40  ;;  %268 = vpow2.f32 %v64_v36 }
  0x9c   :  { %v430_v43 = vpop.xlane.xlu1 %50  ;;  %v432_v44 = vpop.xlane.xlu0 %47 }
  0x9d   :  { %270 = vpow2.f32 %v70_v41  ;;  %v59_v45 = vsub.f32 %v371_v13, %v430_v43  ;;  %v58_v46 = vsub.f32 %v376_v14, %v432_v44 }
  0x9e   :  { %272 = vpow2.f32 %v68_v42 }
  0x9f   :  { %v74_v47 = vmul.f32 1.442695, %v59_v45  ;;  %v72_v48 = vmul.f32 1.442695, %v58_v46  ;;  %v263_v49 = vpop.eup %262 }
  0xa0   :  { %v131_v50 = vpop.permute.xlu1 %130  ;;  %v76_v51 = vsel %vm27_vm0, %v263_v49, 0.0 }
  0xa1   :  { %274 = vpow2.f32 %v74_v47  ;;  %77 = vadd.xlane.f32.xlu1 %v76_v51  ;;  %vm151_vm1 = vcmp.eq.s32.totalorder %v125_v60, %v131_v50 }
  0xa2   :  { %276 = vpow2.f32 %v72_v48  ;;  %v159_v15 = vsel %vm151_vm1, %v348_v6, 0.0 }
  0xa3   :  { %v265_v52 = vpop.eup %264  ;;  %v169_v19 = vsel %vm27_vm0, %v159_v15, 0.0 }
  0xa4   :  { %v267_v54 = vpop.eup %266  ;;  %v134_v55 = vpop.permute.xlu1 %133  ;;  %v85_v56 = vsel %vm27_vm0, %v265_v52, 0.0 }
  0xa5   :  { %v79_v57 = vsel %vm27_vm0, %v267_v54, 0.0  ;;  %v269_v58 = vpop.eup %268  ;;  %86 = vadd.xlane.f32.xlu1 %v85_v56  ;;  %v128_v4 = vpop.permute.xlu0 %127  ;;  %vm152_vm4 = vcmp.eq.s32.totalorder %v125_v60, %v134_v55 }
  0xa6   :  { %80 = vadd.xlane.f32.xlu0 %v79_v57  ;;  %v82_v3 = vsel %vm27_vm0, %v269_v58, 0.0  ;;  %vm150_vm2 = vcmp.eq.s32.totalorder %v125_v60, %v128_v4  ;;  %v160_v24 = vsel %vm152_vm4, %v329_v0, 0.0 }
  0xa7   :  { %v271_v59 = vpop.eup %270  ;;  %v158_v18 = vsel %vm150_vm2, %v334_v1, 0.0 }
  0xa8   :  { %v273_v61 = vpop.eup %272  ;;  %v137_v62 = vpop.permute.xlu1 %136  ;;  %v91_v63 = vsel %vm27_vm0, %v271_v59, 0.0  ;;  %v166_v21 = vsel %vm27_vm0, %v158_v18, 0.0 }
  0xa9   :  { %92 = vadd.xlane.f32.xlu1 %v91_v63  ;;  %v88_v7 = vsel %vm27_vm0, %v273_v61, 0.0  ;;  %vm153_vm3 = vcmp.eq.s32.totalorder %v125_v60, %v137_v62 }
  0xaa   :  { %83 = vadd.xlane.f32.xlu0 %v82_v3  ;;  %v161_v20 = vsel %vm153_vm3, %v339_v2, 0.0  ;;  %v172_v2 = vsel %vm27_vm0, %v160_v24, 0.0 }
  0xab   :  { %v275_v5 = vpop.eup %274  ;;  %v175_v23 = vsel %vm27_vm0, %v161_v20, 0.0 }
  0xac   :  { %v277_v8 = vpop.eup %276  ;;  %v140_v11 = vpop.permute.xlu1 %139  ;;  %v97_v12 = vsel %vm27_vm0, %v275_v5, 0.0 }
  0xad   :  { %98 = vadd.xlane.f32.xlu1 %v97_v12  ;;  %v94_v16 = vsel %vm27_vm0, %v277_v8, 0.0  ;;  %vm154_vm6 = vcmp.eq.s32.totalorder %v125_v60, %v140_v11 }
  0xae   :  { %89 = vadd.xlane.f32.xlu0 %v88_v7  ;;  %v162_v29 = vsel %vm154_vm6, %v362_v10, 0.0 }
  0xb0   :  { %v143_v17 = vpop.permute.xlu1 %142 }
  0xb1   :  { %170 = vadd.xlane.f32.xlu1 %v169_v19  ;;  %vm155_vm5 = vcmp.eq.s32.totalorder %v125_v60, %v143_v17 }
  0xb2   :  { %95 = vadd.xlane.f32.xlu0 %v94_v16  ;;  %v163_v6 = vsel %vm155_vm5, %v357_v9, 0.0  ;;  %v178_v9 = vsel %vm27_vm0, %v162_v29, 0.0 }
  0xb3   :  { %v181_v27 = vsel %vm27_vm0, %v163_v6, 0.0 }
  0xb4   :  { %v146_v22 = vpop.permute.xlu1 %145 }
  0xb5   :  { %176 = vadd.xlane.f32.xlu1 %v175_v23  ;;  %vm156_vm8 = vcmp.eq.s32.totalorder %v125_v60, %v146_v22 }
  0xb6   :  { %167 = vadd.xlane.f32.xlu0 %v166_v21  ;;  %v164_v0 = vsel %vm156_vm8, %v376_v14, 0.0 }
  0xb7   :  { %v184_v33 = vsel %vm27_vm0, %v164_v0, 0.0 }
  0xb8   :  { %v149_v1 = vpop.permute.xlu1 %148 }
  0xb9   :  { %vm157_vm7 = vcmp.eq.s32.totalorder %v125_v60, %v149_v1  ;;  %182 = vadd.xlane.f32.xlu1 %v181_v27 }
  0xba   :  { %173 = vadd.xlane.f32.xlu0 %v172_v2  ;;  %v165_v28 = vsel %vm157_vm7, %v371_v13, 0.0 }
  0xbb   :  { %v187_v32 = vsel %vm27_vm0, %v165_v28, 0.0 }
  0xbd   :  { %188 = vadd.xlane.f32.xlu1 %v187_v32 }
  0xbe   :  { %179 = vadd.xlane.f32.xlu0 %v178_v9 }
  0xc2   :  { %185 = vadd.xlane.f32.xlu0 %v184_v33 }
 0x12e   :  { %v78_v34 = vpop.xlane.xlu1 %77 }
 0x12f   :  { %278 = vlog2.f32 %v78_v34 }
 0x132   :  { %v87_v35 = vpop.xlane.xlu1 %86 }
 0x133   :  { %v81_v36 = vpop.xlane.xlu0 %80  ;;  %280 = vlog2.f32 %v87_v35 }
 0x134   :  { %282 = vlog2.f32 %v81_v36 }
 0x136   :  { %v93_v13 = vpop.xlane.xlu1 %92 }
 0x137   :  { %v84_v10 = vpop.xlane.xlu0 %83  ;;  %284 = vlog2.f32 %v93_v13 }
 0x138   :  { %286 = vlog2.f32 %v84_v10 }
 0x139   :  { %v279_v39 = vpop.eup %278 }
 0x13a   :  { %v99_v40 = vpop.xlane.xlu1 %98  ;;  %v101_v14 = vmul.f32 0.6931472, %v279_v39 }
 0x13b   :  { %v90_v41 = vpop.xlane.xlu0 %89  ;;  %288 = vlog2.f32 %v99_v40 }
 0x13c   :  { %290 = vlog2.f32 %v90_v41  ;;  %v116_v53 = vadd.f32 %v101_v14, %v408_v26 }
 0x13d   :  { %v281_v42 = vpop.eup %280 }
 0x13e   :  { %v283_v45 = vpop.eup %282  ;;  %v107_v46 = vmul.f32 0.6931472, %v281_v42  ;;  %v171_v47 = vpop.xlane.xlu1 %170 }
 0x13f   :  { %v96_v48 = vpop.xlane.xlu0 %95  ;;  %v103_v49 = vmul.f32 0.6931472, %v283_v45 }
 0x140   :  { %292 = vlog2.f32 %v96_v48  ;;  %v119_v50 = vadd.f32 %v107_v46, %v414_v30 }
 0x141   :  { %v285_v51 = vpop.eup %284  ;;  %v117_v52 = vadd.f32 %v103_v49, %v416_v31 }
 0x142   :  { %v287_v54 = vpop.eup %286  ;;  %v111_v55 = vmul.f32 0.6931472, %v285_v51  ;;  %v177_v56 = vpop.xlane.xlu1 %176 }
 0x143   :  { %v168_v57 = vpop.xlane.xlu0 %167  ;;  %v105_v58 = vmul.f32 0.6931472, %v287_v54  ;;  %v191_v59 = vsub.f32 %v117_v52, %v171_v47  ;;  %v193_v60 = vsub.f32 %v119_v50, %v177_v56 }
 0x144   :  { %v465_v61 = vsub.f32 %v116_v53, %v168_v57  ;;  %v121_v62 = vadd.f32 %v111_v55, %v422_v37 }
 0x145   :  { %v289_v63 = vpop.eup %288  ;;  %v199_v3 = vsub.f32 0.0, %v191_v59  ;;  %v201_v4 = vsub.f32 0.0, %v193_v60  ;;  %v118_v31 = vadd.f32 %v105_v58, %v406_v25 }
 0x146   :  { %v198_v30 = vsub.f32 0.0, %v465_v61  ;;  %v291_v5 = vpop.eup %290  ;;  %v115_v26 = vmul.f32 0.6931472, %v289_v63  ;;  %v183_v7 = vpop.xlane.xlu1 %182 }
 0x147   :  { %v174_v8 = vpop.xlane.xlu0 %173  ;;  %v109_v11 = vmul.f32 0.6931472, %v291_v5  ;;  %v208_v12 = vmul.f32 1.442695, %v199_v3  ;;  %v212_v15 = vmul.f32 1.442695, %v201_v4  ;;  %v195_v16 = vsub.f32 %v121_v62, %v183_v7 }
 0x148   :  { %v206_v17 = vmul.f32 1.442695, %v198_v30  ;;  %v192_v18 = vsub.f32 %v118_v31, %v174_v8  ;;  %v123_v19 = vadd.f32 %v115_v26, %v430_v43 }
 0x149   :  { %294 = vpow2.f32 %v208_v12  ;;  %v203_v20 = vsub.f32 0.0, %v195_v16  ;;  %v120_v21 = vadd.f32 %v109_v11, %v424_v38 }
 0x14a   :  { %v293_v37 = vpop.eup %292  ;;  %296 = vpow2.f32 %v212_v15  ;;  %v200_v25 = vsub.f32 0.0, %v192_v18  ;;  %v189_v23 = vpop.xlane.xlu1 %188 }
 0x14b   :  { %v113_v22 = vmul.f32 0.6931472, %v293_v37  ;;  %v180_v6 = vpop.xlane.xlu0 %179  ;;  %298 = vpow2.f32 %v206_v17  ;;  %v216_v24 = vmul.f32 1.442695, %v203_v20  ;;  %v197_v1 = vsub.f32 %v123_v19, %v189_v23 }
 0x14c   :  { %v194_v27 = vsub.f32 %v120_v21, %v180_v6  ;;  %v210_v2 = vmul.f32 1.442695, %v200_v25 }
 0x14d   :  { %v122_v28 = vadd.f32 %v113_v22, %v432_v44  ;;  %300 = vpow2.f32 %v216_v24  ;;  %v205_v29 = vsub.f32 0.0, %v197_v1 }
 0x14e   :  { %v202_v43 = vsub.f32 0.0, %v194_v27  ;;  %302 = vpow2.f32 %v210_v2 }
 0x14f   :  { %v186_v32 = vpop.xlane.xlu0 %185  ;;  %v220_v9 = vmul.f32 1.442695, %v205_v29 }
 0x150   :  { %v214_v0 = vmul.f32 1.442695, %v202_v43  ;;  %v196_v38 = vsub.f32 %v122_v28, %v186_v32 }
 0x151   :  { %304 = vpow2.f32 %v220_v9 }
 0x152   :  { %v204_v33 = vsub.f32 0.0, %v196_v38  ;;  %306 = vpow2.f32 %v214_v0 }
 0x153   :  { %v295_v34 = vpop.eup %294 }
 0x154   :  { %v218_v35 = vmul.f32 1.442695, %v204_v33  ;;  %v297_v36 = vpop.eup %296  ;;  %v223_v13 = vsub.f32 1.0, %v295_v34 }
 0x155   :  { %v299_v10 = vpop.eup %298  ;;  %v225_v39 = vsub.f32 1.0, %v297_v36 }
 0x156   :  { %308 = vpow2.f32 %v218_v35  ;;  %v231_v40 = vmul.f32 %v223_v13, %v223_v13  ;;  %v222_v44 = vsub.f32 1.0, %v299_v10 }
 0x157   :  { %v301_v41 = vpop.eup %300  ;;  %v233_v42 = vmul.f32 %v225_v39, %v225_v39 }
 0x158   :  { %v303_v14 = vpop.eup %302  ;;  %v239_v45 = vmul.f32 %v231_v40, %v191_v59  ;;  %v230_v46 = vmul.f32 %v222_v44, %v222_v44  ;;  %v227_v47 = vsub.f32 1.0, %v301_v41 }
 0x159   :  { %v241_v48 = vmul.f32 %v233_v42, %v193_v60  ;;  %v224_v49 = vsub.f32 1.0, %v303_v14 }
 0x15a   :  { %248 = vst.msk [vmem:[%s508_s2 + $0x8] sm:$0xff] %vm246_vm9, %v239_v45  ;;  %v238_v50 = vmul.f32 %v230_v46, %v465_v61  ;;  %v235_v51 = vmul.f32 %v227_v47, %v227_v47 }
 0x15b   :  { %v305_v52 = vpop.eup %304  ;;  %250 = vst.msk [vmem:[%s508_s2 + $0x18] sm:$0xff] %vm246_vm9, %v241_v48  ;;  %v232_v53 = vmul.f32 %v224_v49, %v224_v49 }
 0x15c   :  { %v307_v54 = vpop.eup %306  ;;  %247 = vst.msk [vmem:[%s508_s2] sm:$0xff] %vm246_vm9, %v238_v50  ;;  %v243_v55 = vmul.f32 %v235_v51, %v195_v16  ;;  %v229_v56 = vsub.f32 1.0, %v305_v52 }
 0x15d   :  { %v240_v57 = vmul.f32 %v232_v53, %v192_v18  ;;  %v226_v58 = vsub.f32 1.0, %v307_v54 }
 0x15e   :  { %252 = vst.msk [vmem:[%s508_s2 + $0x28] sm:$0xff] %vm246_vm9, %v243_v55  ;;  %v237_v59 = vmul.f32 %v229_v56, %v229_v56 }
 0x15f   :  { %249 = vst.msk [vmem:[%s508_s2 + $0x10] sm:$0xff] %vm246_vm9, %v240_v57  ;;  %v234_v61 = vmul.f32 %v226_v58, %v226_v58 }
 0x160   :  { %v309_v60 = vpop.eup %308  ;;  %v245_v62 = vmul.f32 %v237_v59, %v197_v1 }
 0x161   :  { %v228_v63 = vsub.f32 1.0, %v309_v60  ;;  %v242_v3 = vmul.f32 %v234_v61, %v194_v27 }
 0x162   :  { %254 = vst.msk [vmem:[%s508_s2 + $0x38] sm:$0xff] %vm246_vm9, %v245_v62 }
 0x163   :  { %v236_v4 = vmul.f32 %v228_v63, %v228_v63  ;;  %251 = vst.msk [vmem:[%s508_s2 + $0x20] sm:$0xff] %vm246_vm9, %v242_v3 }
 0x165   :  { %v244_v30 = vmul.f32 %v236_v4, %v196_v38 }
 0x167   :  { %253 = vst.msk [vmem:[%s508_s2 + $0x30] sm:$0xff] %vm246_vm9, %v244_v30 }

</bundles_post_ra>
